<compile_context>
chip_gen: v7x
topology: tpu7x:2x2x1
jax: 0.10.0
libtpu: 0.0.40
codegen_flags: <defaults>
</compile_context>

<pallas_src>
import jax
import jax.numpy as jnp
from jax.experimental import pallas as pl
from jax.experimental.pallas import tpu as pltpu

NEG_PAD = -1.0e30   # finite large-negative bias for padded logits (exp -> 0)
H_PAD = 128         # hidden padded to a full lane width (lane-dense matmuls)
A_PAD = 128         # logit width inside the kernel (lane-dense softmax reduce)
TB_MAX = 2048       # max batch-tile rows (well under any scoped-VMEM limit)


def actor_kernel(x_ref, w1t_ref, b1_ref, w2t_ref, b2_ref, out_ref):
    x = x_ref[...]                                             # [TB, state_dim]

    # fc1 + ReLU (weights pre-transposed to [state_dim, H_PAD] -> no in-kernel .T)
    h = jnp.dot(x, w1t_ref[...],
                preferred_element_type=jnp.float32) + b1_ref[...]   # [TB, H_PAD]
    h = jnp.maximum(h, 0.0)

    # fc2 logits; padded out-columns carry bias = NEG_PAD so exp() -> exactly 0
    logits = jnp.dot(h, w2t_ref[...],
                     preferred_element_type=jnp.float32) + b2_ref[...]  # [TB, A_PAD]

    # numerically stable softmax over the last (lane) axis, exact divide
    m = jnp.max(logits, axis=-1, keepdims=True)
    e = jnp.exp(logits - m)
    denom = jnp.sum(e, axis=-1, keepdims=True)
    probs = e / denom                                           # [TB, A_PAD]

    # narrow writeback: only the first A_OUT (>= action_dim) columns hit HBM
    out_ref[...] = probs[:, : out_ref.shape[1]]


def prepare_actor_params(w1, b1, w2, b2, h_pad=H_PAD, a_pad=A_PAD):
    """One-time prep: transpose to [in, out] layout and zero-pad to lane widths."""
    hidden, state_dim = w1.shape          # PyTorch layout [out, in]
    action_dim = w2.shape[0]
    assert hidden <= h_pad and action_dim <= a_pad

    a_out = max(8, ((action_dim + 7) // 8) * 8)   # narrow output width

    w1t = jnp.zeros((state_dim, h_pad), jnp.float32).at[:, :hidden].set(w1.T)
    b1p = jnp.zeros((1, h_pad), jnp.float32).at[:, :hidden].set(b1.reshape(1, -1))
    w2t = jnp.zeros((h_pad, a_pad), jnp.float32).at[:hidden, :action_dim].set(w2.T)
    # padded out-features get a huge negative bias so exp() underflows to 0
    b2p = jnp.full((1, a_pad), NEG_PAD, jnp.float32).at[:, :action_dim].set(
        b2.reshape(1, -1))
    return w1t, b1p, w2t, b2p, action_dim, a_out


def actor_forward(x, w1t, b1p, w2t, b2p, action_dim, a_out,
                  *, min_pallas_batch=0):
    """softmax(relu(x @ W1 + b1) @ W2 + b2) via a Pallas TPU kernel."""
    B, state_dim = x.shape
    h_pad = w1t.shape[1]
    a_pad = w2t.shape[1]

    # Tiny-batch fallback: pallas_call launch (~us) would dominate; fused XLA
    # is strictly faster there. Default 0 so the Pallas path is always used here.
    if B < min_pallas_batch:
        h = jnp.maximum(x @ w1t + b1p, 0.0)
        return jax.nn.softmax(h @ w2t + b2p, axis=1)[:, :action_dim]

    if B <= TB_MAX:
        # Single tile: block shape == full array shape (exempt from (8,128)
        # divisibility), so no host-side pad/copy of x is needed.
        n_steps, tb, b_pad = 1, B, B
        x_in = x
    else:
        # Large rollout batches: fewer, bigger tiles; EVEN grid count >= 2 so
        # both v7x TensorCores are used ("parallel" axis shards across TCs).
        n_steps = -(-B // TB_MAX)
        if n_steps % 2:
            n_steps += 1
        tb = ((-(-B // n_steps) + 7) // 8) * 8
        b_pad = tb * n_steps
        if b_pad != B:
            x_in = jnp.zeros((b_pad, state_dim), jnp.float32).at[:B].set(x)
        else:
            x_in = x

    cost = pl.CostEstimate(
        flops=2 * b_pad * (state_dim * h_pad + h_pad * a_pad),
        transcendentals=b_pad * a_pad,
        bytes_accessed=4 * (b_pad * state_dim + state_dim * h_pad + h_pad
                            + h_pad * a_pad + a_pad + b_pad * a_out),
    )

    out = pl.pallas_call(
        actor_kernel,
        out_shape=jax.ShapeDtypeStruct((b_pad, a_out), jnp.float32),
        grid=(n_steps,),
        in_specs=[
            pl.BlockSpec((tb, state_dim), lambda i: (i, 0)),      # x: batch-tiled
            pl.BlockSpec((state_dim, h_pad), lambda i: (0, 0)),   # w1t (resident)
            pl.BlockSpec((1, h_pad), lambda i: (0, 0)),           # b1
            pl.BlockSpec((h_pad, a_pad), lambda i: (0, 0)),       # w2t (resident)
            pl.BlockSpec((1, a_pad), lambda i: (0, 0)),           # b2 (NEG_PAD pad)
        ],
        out_specs=pl.BlockSpec((tb, a_out), lambda i: (i, 0)),
        compiler_params=pltpu.CompilerParams(
            dimension_semantics=("parallel",)),
        cost_estimate=cost,
    )(x_in, w1t, b1p, w2t, b2p)

    return out[:B, :action_dim]


def init_linear_params(key, out_features, in_features):
    # Deterministic PyTorch-style Linear init: U(-1/sqrt(fan_in), 1/sqrt(fan_in))
    kw, kb = jax.random.split(key)
    bound = 1.0 / jnp.sqrt(jnp.float32(in_features))
    w = jax.random.uniform(kw, (out_features, in_features),
                           minval=-bound, maxval=bound, dtype=jnp.float32)
    b = jax.random.uniform(kb, (out_features,),
                           minval=-bound, maxval=bound, dtype=jnp.float32)
    return w, b


if __name__ == "__main__":
    # CartPole-like dims: state_dim=4, action_dim=2, small batch
    state_dim, action_dim, hidden, batch = 4, 2, 64, 2

    key = jax.random.PRNGKey(0)
    kx, k1, k2 = jax.random.split(key, 3)

    x = jax.random.normal(kx, (batch, state_dim), dtype=jnp.float32)
    w1, b1 = init_linear_params(k1, hidden, state_dim)      # fc1: [64, 4], [64]
    w2, b2 = init_linear_params(k2, action_dim, hidden)     # fc2: [2, 64], [2]

    # One-time param prep (transpose + lane-dense padding), then the kernel.
    w1t, b1p, w2t, b2p, a_dim, a_out = prepare_actor_params(w1, b1, w2, b2)
    out = actor_forward(x, w1t, b1p, w2t, b2p, a_dim, a_out)
    jax.block_until_ready(out)

    # Pure-JAX reference of the same math.
    h_ref = jnp.maximum(x @ w1.T + b1, 0.0)
    ref = jax.nn.softmax(h_ref @ w2.T + b2, axis=1)
    assert out.shape == (batch, action_dim)
    # exact divide in-kernel -> tight tolerance
    assert jnp.allclose(out, ref, atol=1e-5, rtol=1e-5), float(jnp.abs(out - ref).max())
    assert jnp.allclose(jnp.sum(out, axis=1), 1.0, atol=1e-5)

    print("KERNEL_OK")
</pallas_src>

<mosaic_0001>
module attributes {stable_mosaic.version = 11 : i64} {
  func.func @actor_kernel(%arg0: i32, %arg1: memref<2x4xf32, #tpu.memory_space<vmem>>, %arg2: memref<4x128xf32, #tpu.memory_space<vmem>>, %arg3: memref<1x128xf32, #tpu.memory_space<vmem>>, %arg4: memref<128x128xf32, #tpu.memory_space<vmem>>, %arg5: memref<1x128xf32, #tpu.memory_space<vmem>>, %arg6: memref<2x8xf32, #tpu.memory_space<vmem>>) attributes {dimension_semantics = [#tpu.dimension_semantics<parallel>], iteration_bounds = array<i64: 1>, scalar_prefetch = 0 : i64, scratch_operands = 0 : i64, tpu.core_type = #tpu.core_type<tc>, window_params = [{transform_indices = @transform_0, window_bounds = array<i64: 2, 4>}, {pipeline_mode = #tpu.pipeline_mode<synchronous>, transform_indices = @transform_1, window_bounds = array<i64: 4, 128>}, {pipeline_mode = #tpu.pipeline_mode<synchronous>, transform_indices = @transform_2, window_bounds = array<i64: 1, 128>}, {pipeline_mode = #tpu.pipeline_mode<synchronous>, transform_indices = @transform_3, window_bounds = array<i64: 128, 128>}, {pipeline_mode = #tpu.pipeline_mode<synchronous>, transform_indices = @transform_4, window_bounds = array<i64: 1, 128>}, {transform_indices = @transform_5, window_bounds = array<i64: 2, 8>}]} {
    %c0 = arith.constant 0 : index
    %c0_0 = arith.constant 0 : index
    %0 = vector.load %arg1[%c0, %c0_0] : memref<2x4xf32, #tpu.memory_space<vmem>>, vector<2x4xf32>
    %c0_1 = arith.constant 0 : index
    %c0_2 = arith.constant 0 : index
    %1 = vector.load %arg2[%c0_1, %c0_2] : memref<4x128xf32, #tpu.memory_space<vmem>>, vector<4x128xf32>
    %cst = arith.constant dense<0.000000e+00> : vector<2x128xf32>
    %2 = tpu.matmul %0, %1, %cst {dimension_numbers = #tpu.dot_dimension_numbers<[1], [0], [0], [1], [0, 0, 1, 1], [], []>} : vector<2x4xf32>, vector<4x128xf32>, vector<2x128xf32> -> vector<2x128xf32>
    %c0_3 = arith.constant 0 : index
    %c0_4 = arith.constant 0 : index
    %3 = vector.load %arg3[%c0_3, %c0_4] : memref<1x128xf32, #tpu.memory_space<vmem>>, vector<1x128xf32>
    %4 = vector.broadcast %3 : vector<1x128xf32> to vector<2x128xf32>
    %5 = arith.addf %2, %4 : vector<2x128xf32>
    %cst_5 = arith.constant 0.000000e+00 : f32
    %6 = vector.broadcast %cst_5 : f32 to vector<2x128xf32>
    %7 = arith.maximumf %5, %6 : vector<2x128xf32>
    %c0_6 = arith.constant 0 : index
    %c0_7 = arith.constant 0 : index
    %8 = vector.load %arg4[%c0_6, %c0_7] : memref<128x128xf32, #tpu.memory_space<vmem>>, vector<128x128xf32>
    %cst_8 = arith.constant dense<0.000000e+00> : vector<2x128xf32>
    %9 = tpu.matmul %7, %8, %cst_8 {dimension_numbers = #tpu.dot_dimension_numbers<[1], [0], [0], [1], [0, 0, 1, 1], [], []>} : vector<2x128xf32>, vector<128x128xf32>, vector<2x128xf32> -> vector<2x128xf32>
    %c0_9 = arith.constant 0 : index
    %c0_10 = arith.constant 0 : index
    %10 = vector.load %arg5[%c0_9, %c0_10] : memref<1x128xf32, #tpu.memory_space<vmem>>, vector<1x128xf32>
    %11 = vector.broadcast %10 : vector<1x128xf32> to vector<2x128xf32>
    %12 = arith.addf %9, %11 : vector<2x128xf32>
    %cst_11 = arith.constant dense<0xFF800000> : vector<2xf32>
    %13 = vector.multi_reduction <maximumf>, %12, %cst_11 [1] : vector<2x128xf32> to vector<2xf32>
    %14 = vector.shape_cast %13 : vector<2xf32> to vector<2x1xf32>
    %15 = vector.broadcast %14 : vector<2x1xf32> to vector<2x128xf32>
    %16 = arith.subf %12, %15 : vector<2x128xf32>
    %17 = math.exp %16 : vector<2x128xf32>
    %cst_12 = arith.constant dense<0.000000e+00> : vector<2xf32>
    %18 = vector.multi_reduction <add>, %17, %cst_12 [1] : vector<2x128xf32> to vector<2xf32>
    %19 = vector.shape_cast %18 : vector<2xf32> to vector<2x1xf32>
    %20 = vector.broadcast %19 : vector<2x1xf32> to vector<2x128xf32>
    %21 = arith.divf %17, %20 : vector<2x128xf32>
    %22 = vector.extract_strided_slice %21 {offsets = [0, 0], sizes = [2, 8], strides = [1, 1]} : vector<2x128xf32> to vector<2x8xf32>
    %c0_13 = arith.constant 0 : index
    %c0_14 = arith.constant 0 : index
    %23 = vector.load %arg6[%c0_13, %c0_14] : memref<2x8xf32, #tpu.memory_space<vmem>>, vector<2x8xf32>
    tpu.vector_store %arg6[%c0_13, %c0_14], %22 {strides = array<i32>} : memref<2x8xf32, #tpu.memory_space<vmem>>, vector<2x8xf32>,
    return
  }
  func.func @transform_0(%arg0: i32) -> (i32, i32) {
    %c0_i32 = arith.constant 0 : i32
    %c0_i32_0 = arith.constant 0 : i32
    return %arg0, %c0_i32 : i32, i32
  }
  func.func @transform_1(%arg0: i32) -> (i32, i32) {
    %c0_i32 = arith.constant 0 : i32
    %c0_i32_0 = arith.constant 0 : i32
    %c0_i32_1 = arith.constant 0 : i32
    return %c0_i32, %c0_i32_0 : i32, i32
  }
  func.func @transform_2(%arg0: i32) -> (i32, i32) {
    %c0_i32 = arith.constant 0 : i32
    %c0_i32_0 = arith.constant 0 : i32
    %c0_i32_1 = arith.constant 0 : i32
    return %c0_i32, %c0_i32_0 : i32, i32
  }
  func.func @transform_3(%arg0: i32) -> (i32, i32) {
    %c0_i32 = arith.constant 0 : i32
    %c0_i32_0 = arith.constant 0 : i32
    %c0_i32_1 = arith.constant 0 : i32
    return %c0_i32, %c0_i32_0 : i32, i32
  }
  func.func @transform_4(%arg0: i32) -> (i32, i32) {
    %c0_i32 = arith.constant 0 : i32
    %c0_i32_0 = arith.constant 0 : i32
    %c0_i32_1 = arith.constant 0 : i32
    return %c0_i32, %c0_i32_0 : i32, i32
  }
  func.func @transform_5(%arg0: i32) -> (i32, i32) {
    %c0_i32 = arith.constant 0 : i32
    %c0_i32_0 = arith.constant 0 : i32
    return %arg0, %c0_i32 : i32, i32
  }
}

</mosaic_0001>

<bundles_post_ra>
// kernel: tpu_custom_call.1
= control target key start
LH: loop header
LB: loop body
LE: loop exit
PB: predicated region body
PF: predicated region fallthrough
CT: control target
= control target key end

     0   :  { %10 = vsyncpa [#allocation3], 0  ;;  %s556_s0 = inlined_call_operand.hbm [shape: f32[2,4], index: 0, kind: input, shape index: {}]   ;;  %s557_s1 = inlined_call_operand.hbm [shape: f32[4,128], index: 1, kind: input, shape index: {}]   ;;  %s558_s2 = inlined_call_operand.vmem [shape: f32[1,128], index: 2, kind: input, shape index: {}]   ;;  %s559_s3 = inlined_call_operand.hbm [shape: f32[128,128], index: 3, kind: input, shape index: {}]   ;;  %s560_s4 = inlined_call_operand.vmem [shape: f32[1,128], index: 4, kind: input, shape index: {}]   ;;  %s561_s5 = inlined_call_operand.hbm [shape: f32[2,8], index: 5, kind: output, shape index: {}]  }
   0x1   :  { %11 = vsyncpa [#allocation6], 0 }
   0x2   :  { %12 = vsyncpa [#allocation4], 0  ;;  %s463_s18 = smov [#allocation5]   ;;  %s464_s20 = smov [#allocation2]  }
   0x3   :  { %s29_s19 = sshll.u32 %s463_s18, 4  ;;  %s19_s21 = sshll.u32 %s464_s20, 4  ;;  %s30_s19 = int_to_ptr.vmem [resolvable:$true] %s29_s19  ;;  %s20_s21 = int_to_ptr.vmem [resolvable:$true] %s19_s21 }
   0x4   :  { %s369_s24 = scalar_lea.hbm %s557_s1, 64 }
   0x5   :  { %p370_p0 = scmp.ne.s32.totalorder %s557_s1, %s369_s24  ;;  %p373_p1 = scmp.lt.u32.totalorder %s369_s24, %s557_s1 }
   0x7   :  { %p375_p2 = pnand %p373_p1, %p370_p0 }
   0x9   :  { %378 = shalt.err (!%p375_p2)
}
   0xa   :  { %s379_s29 = scalar_lea.vmem %s30_s19, 64  ;;  %p384_p4 = scmp.lt.s32.totalorder %s30_s19, %s30_s19 }
   0xb   :  { %p380_p3 = scmp.ne.s32.totalorder %s30_s19, %s379_s29  ;;  %p385_p5 = scmp.lt.s32.totalorder %s379_s29, %s379_s29 }
   0xd   :  { %p386_p6 = por %p385_p5, %p384_p4 }
   0xf   :  { %p387_p7 = pnand %p386_p6, %p380_p3 }
  0x11   :  { %390 = shalt.err (!%p387_p7)
}
  0x12   :  { %32 = dma.hbm_to_vmem [thread:$0]  %s557_s1, 64, %s30_s19, [#allocation6]  }
  0x13   :  { %s391_s9 = scalar_lea.hbm %s556_s0, 32 }
  0x14   :  { %p392_p8 = scmp.ne.s32.totalorder %s556_s0, %s391_s9  ;;  %p395_p9 = scmp.lt.u32.totalorder %s391_s9, %s556_s0 }
  0x16   :  { %p397_p10 = pnand %p395_p9, %p392_p8 }
  0x18   :  { %400 = shalt.err (!%p397_p10)
}
  0x19   :  { %s401_s14 = scalar_lea.vmem %s20_s21, 32  ;;  %p406_p12 = scmp.lt.s32.totalorder %s20_s21, %s20_s21 }
  0x1a   :  { %p402_p11 = scmp.ne.s32.totalorder %s20_s21, %s401_s14  ;;  %p407_p13 = scmp.lt.s32.totalorder %s401_s14, %s401_s14 }
  0x1c   :  { %p408_p0 = por %p407_p13, %p406_p12 }
  0x1e   :  { %p409_p1 = pnand %p408_p0, %p402_p11 }
  0x20   :  { %412 = shalt.err (!%p409_p1)
}
  0x21   :  { %22 = dma.hbm_to_vmem [thread:$0]  %s556_s0, 32, %s20_s21, [#allocation3]  }
  0x22   :  { %s465_s16 = smov [#allocation7]   ;;  %s413_s20 = scalar_lea.hbm %s559_s3, 2048 }
  0x23   :  { %s40_s17 = sshll.u32 %s465_s16, 4  ;;  %p414_p2 = scmp.ne.s32.totalorder %s559_s3, %s413_s20  ;;  %s41_s17 = int_to_ptr.vmem [resolvable:$true] %s40_s17 }
  0x24   :  { %p417_p3 = scmp.lt.u32.totalorder %s413_s20, %s559_s3 }
  0x26   :  { %p419_p4 = pnand %p417_p3, %p414_p2 }
  0x28   :  { %422 = shalt.err (!%p419_p4)
}
  0x29   :  { %s423_s26 = scalar_lea.vmem %s41_s17, 2048  ;;  %p428_p6 = scmp.lt.s32.totalorder %s41_s17, %s41_s17 }
  0x2a   :  { %p424_p5 = scmp.ne.s32.totalorder %s41_s17, %s423_s26  ;;  %p429_p7 = scmp.lt.s32.totalorder %s423_s26, %s423_s26 }
  0x2c   :  { %p430_p8 = por %p429_p7, %p428_p6 }
  0x2e   :  { %p431_p9 = pnand %p430_p8, %p424_p5 }
  0x30   :  { %434 = shalt.err (!%p431_p9)
}
  0x31   :  { %s466_s0 = smov 128   ;;  %s467_s21 = smov 8  }
  0x32   :  { %46 = dma.hbm_to_vmem [thread:$0]  %s559_s3, 2048, %s41_s17, [#allocation6], %s466_s0, %s466_s0, %s467_s21  }
  0x33   :  { %457 = dma.done.wait [#allocation3], 32  }
  0x34   :  { %458 = vsyncadd [#allocation3], 4294967264 }
  0x35   :  { %459 = dma.done.wait [#allocation6], 2112  }
  0x36   :  { %460 = vsyncadd [#allocation6], 4294965184  ;;  %v468_v0 = vmov 0.0   ;;  %vm469_vm0 = vmmov 0   ;;  %v470_v1 = vmov 0.0|0.0   ;;  %vm71_vm1 = vcmask 1043456  }
  0x37   :  { %292 = vmatprep.subr.mxu0 %v468_v0  ;;  %294 = vmatprep.mubr.msk.f32.mxu0 %vm469_vm0, %v468_v0  ;;  %vm67_vm2 = vcmask 31744   ;;  %v59_v2 = vld [vmem:[#allocation5] sm:$0xf]  ;;  %v58_v3 = vld [vmem:[#allocation2] sm:$0x3]  ;;  %v146_v4 = vld [vmem:[#allocation7] sm:$0xff] }
  0x38   :  { %332 = vmatprep.subr.bf16.mxu1 %v470_v1  ;;  %329 = vmatprep.mubr.msk.f32.mxu1 %vm469_vm0, %v468_v0  ;;  %v147_v5 = vld [vmem:[#allocation7 + $0x8] sm:$0xff]  ;;  %v148_v6 = vld [vmem:[#allocation7 + $0x10] sm:$0xff]  ;;  %v149_v7 = vld [vmem:[#allocation7 + $0x18] sm:$0xff]  ;;  %vm239_vm3 = vcmask 1041408   ;;  %vm251_vm4 = vcmask 58368  }
  0x39   :  { %293 = vmatpush3.msk.msra.mxu0 %vm71_vm1, %v59_v2  ;;  %v333_v8 = vpack.c.bf16 %v147_v5, %v146_v4  ;;  %v336_v9 = vpack.c.bf16 %v149_v7, %v148_v6  ;;  %v150_v10 = vld [vmem:[#allocation7 + $0x20] sm:$0xff]  ;;  %v151_v11 = vld [vmem:[#allocation7 + $0x28] sm:$0xff]  ;;  %v152_v13 = vld [vmem:[#allocation7 + $0x30] sm:$0xff] }
  0x3a   :  { %295 = vmatmul.mubr.msk.f32.vlgmr.msra.gmra.mrb[0].mxu0 %vm67_vm2, %v58_v3  ;;  %v339_v12 = vpack.c.bf16 %v151_v11, %v150_v10  ;;  %v153_v14 = vld [vmem:[#allocation7 + $0x38] sm:$0xff]  ;;  %v154_v16 = vld [vmem:[#allocation7 + $0x40] sm:$0xff]  ;;  %v155_v17 = vld [vmem:[#allocation7 + $0x48] sm:$0xff] }
  0x3b   :  { %334 = vmatpush3.bf16.msra.mxu1 %v333_v8  ;;  %v342_v15 = vpack.c.bf16 %v153_v14, %v152_v13  ;;  %v345_v18 = vpack.c.bf16 %v155_v17, %v154_v16  ;;  %v156_v19 = vld [vmem:[#allocation7 + $0x50] sm:$0xff]  ;;  %v157_v20 = vld [vmem:[#allocation7 + $0x58] sm:$0xff]  ;;  %v158_v22 = vld [vmem:[#allocation7 + $0x60] sm:$0xff] }
  0x3c   :  { %335 = vmatprep.subr.bf16.mxu1 %v470_v1  ;;  %v348_v21 = vpack.c.bf16 %v157_v20, %v156_v19  ;;  %v159_v23 = vld [vmem:[#allocation7 + $0x68] sm:$0xff]  ;;  %v160_v25 = vld [vmem:[#allocation7 + $0x70] sm:$0xff]  ;;  %v161_v26 = vld [vmem:[#allocation7 + $0x78] sm:$0xff] }
  0x3d   :  { %v351_v24 = vpack.c.bf16 %v159_v23, %v158_v22  ;;  %v354_v27 = vpack.c.bf16 %v161_v26, %v160_v25  ;;  %v269_v28 = vld [vmem:[%s558_s2] ss:$0 sm:$0xff]  ;;  %s471_s2 = smov [#allocation8]  }
  0x3e   :  { %v272_v33 = vld [vmem:[%s560_s4] ss:$0 sm:$0xff]  ;;  %s259_s7 = sshll.u32 %s471_s2, 4  ;;  %s260_s7 = int_to_ptr.vmem [resolvable:$true] %s259_s7 }
  0x3f   :  { %337 = vmatpush3.bf16.msra.mxu1 %v336_v9  ;;  %s435_s4 = scalar_lea.vmem %s260_s7, 32  ;;  %p440_p11 = scmp.lt.s32.totalorder %s260_s7, %s260_s7 }
  0x40   :  { %338 = vmatprep.subr.bf16.mxu1 %v470_v1  ;;  %p436_p10 = scmp.ne.s32.totalorder %s260_s7, %s435_s4  ;;  %p441_p12 = scmp.lt.s32.totalorder %s435_s4, %s435_s4 }
  0x42   :  { %p442_p13 = por %p441_p12, %p440_p11 }
  0x43   :  { %340 = vmatpush3.bf16.msra.mxu1 %v339_v12 }
  0x44   :  { %341 = vmatprep.subr.bf16.mxu1 %v470_v1  ;;  %p443_p0 = pnand %p442_p13, %p436_p10 }
  0x47   :  { %343 = vmatpush3.bf16.msra.mxu1 %v342_v15 }
  0x48   :  { %344 = vmatprep.subr.bf16.mxu1 %v470_v1 }
  0x4b   :  { %346 = vmatpush3.bf16.msra.mxu1 %v345_v18 }
  0x4c   :  { %347 = vmatprep.subr.bf16.mxu1 %v470_v1 }
  0x4f   :  { %349 = vmatpush3.bf16.msra.mxu1 %v348_v21 }
  0x50   :  { %350 = vmatprep.subr.bf16.mxu1 %v470_v1 }
  0x53   :  { %352 = vmatpush3.bf16.msra.mxu1 %v351_v24 }
  0x54   :  { %353 = vmatprep.subr.bf16.mxu1 %v470_v1 }
  0x57   :  { %355 = vmatpush3.bf16.msra.mxu1 %v354_v27 }
 0x10d   :  { %v141_v29 = vpop.f32.mrb[0].mxu0 }
 0x10e   :  { %v142_v30 = vadd.f32 %v269_v28, %v141_v29  ;;  %v296_v31 = vpop.f32.mrb[1].mxu0 }
 0x110   :  { %v145_v32 = vmax.f32 %v142_v30, 0.0 }
 0x112   :  { %330 = vmatmul.mubr.f32.vlgmr.msra.gmra.mrb[0].mxu1 %v145_v32 }
 0x1e5   :  { %v235_v34 = vpop.f32.mrb[0].mxu1 }
 0x1e6   :  { %v236_v35 = vadd.f32 %v272_v33, %v235_v34  ;;  %v331_v36 = vpop.f32.mrb[1].mxu1 }
 0x1e8   :  { %v240_v37 = vsel %vm239_vm3, %v236_v35, -inf }
 0x1e9   :  { %241 = vmax.xlane.f32.xlu0 %v240_v37 }
 0x276   :  { %v242_v38 = vpop.xlane.xlu0 %241 }
 0x277   :  { %v243_v39 = vsub.f32 %v236_v35, %v242_v38 }
 0x279   :  { %v244_v40 = vmul.f32 1.442695, %v243_v39 }
 0x27b   :  { %365 = vpow2.f32 %v244_v40 }
 0x285   :  { %v366_v41 = vpop.eup %365 }
 0x286   :  { %v246_v42 = vsel %vm239_vm3, %v366_v41, 0.0 }
 0x287   :  { %247 = vadd.xlane.f32.xlu0 %v246_v42 }
 0x314   :  { %v248_v43 = vpop.xlane.xlu0 %247 }
 0x315   :  { %367 = vrcp.f32 %v248_v43 }
 0x31f   :  { %v368_v44 = vpop.eup %367 }
 0x320   :  { %v250_v45 = vmul.f32 %v368_v44, %v366_v41 }
 0x322   :  { %252 = vst.msk [vmem:[#allocation8] sm:$0x3] %vm251_vm4, %v250_v45 }
 0x323   :  { %446 = shalt.err (!%p443_p0)
}
 0x324   :  { %s447_s10 = scalar_lea.hbm %s561_s5, 32 }
 0x325   :  { %p448_p1 = scmp.ne.s32.totalorder %s561_s5, %s447_s10  ;;  %p451_p2 = scmp.lt.u32.totalorder %s447_s10, %s561_s5 }
 0x327   :  { %p453_p3 = pnand %p451_p2, %p448_p1 }
 0x329   :  { %456 = shalt.err (!%p453_p3)
}
 0x32a   :  { %262 = dma.vmem_to_hbm [thread:$0]  %s260_s7, 32, %s561_s5, [#allocation4]  }
 0x32b   :  { %461 = dma.done.wait [#allocation4], 32  }
 0x32c   :  { %462 = vsyncadd [#allocation4], 4294967264 }
 0x32d   :  { %266 = vsyncpa [#allocation3], 1 }
 0x32e   :  { %267 = vsyncpa [#allocation6], 1 }
 0x32f   :  { %268 = vsyncpa [#allocation4], 1 }

</bundles_post_ra>
